<compile_context>
chip_gen: v7x
topology: tpu7x:2x2x1
jax: 0.10.0
libtpu: 0.0.40
codegen_flags: <defaults>
</compile_context>

<pallas_src>
import jax
import jax.numpy as jnp
from jax.experimental import pallas as pl
from jax.experimental.pallas import tpu as pltpu


LANE = 128          # lane width (last dim must be a multiple of this)
BF16_SUBLANE = 16   # bf16 native sublane packing for the second-to-last dim


def _round_up(x, m):
    return (x + m - 1) // m * m


def _vmem_capacity_bytes(default_bytes=128 << 20):
    try:
        return int(pltpu.get_tpu_info().vmem_capacity_bytes)
    except Exception:
        return default_bytes


def _block_spec(block_shape, index_map, single_buffer=False):
    """BlockSpec; single_buffer requests Buffered(1) for constant-index operands."""
    if single_buffer:
        try:
            return pl.BlockSpec(block_shape, index_map,
                                pipeline_mode=pl.Buffered(1))
        except Exception:
            pass  # older jax without pipeline_mode -> default double buffering
    return pl.BlockSpec(block_shape, index_map)


def mlp_expert_kernel(x_ref, w1_ref, b1_ref, w2_ref, b2_ref, o_ref):
    """One (batch-tile, n-tile) block of the 2-layer MLP.

    bf16 operands on the MXU with f32 accumulation; bias-add + ReLU stay in f32
    on the VPU (v5e has no bf16 VPU); hidden activations are cast back to bf16
    for the second MXU pass.  Dropout = identity (inference).
    """
    h = jnp.dot(x_ref[...], w1_ref[...], preferred_element_type=jnp.float32)
    h = jnp.maximum(h + b1_ref[...], 0.0)

    o = jnp.dot(h.astype(jnp.bfloat16), w2_ref[...],
                preferred_element_type=jnp.float32)
    o = jnp.maximum(o + b2_ref[...], 0.0)

    o_ref[...] = o.astype(o_ref.dtype)


def prepare_mlp_expert_params(w1, b1, w2, b2):
    """Pad + cast weights to lane-aligned bf16 ONCE (hoisted out of the call path).

    w1: [input_dim, hidden]; w2: [hidden, hidden]; b1/b2: [hidden] or [1, hidden].
    """
    in_dim, hidden = w1.shape
    assert w2.shape == (hidden, hidden)
    in_p = _round_up(in_dim, LANE)
    hid_p = _round_up(hidden, LANE)

    w1p = jnp.zeros((in_p, hid_p), jnp.bfloat16).at[:in_dim, :hidden].set(
        w1.astype(jnp.bfloat16))
    w2p = jnp.zeros((hid_p, hid_p), jnp.bfloat16).at[:hidden, :hidden].set(
        w2.astype(jnp.bfloat16))
    b1p = jnp.zeros((1, hid_p), jnp.float32).at[:, :hidden].set(
        b1.reshape(1, -1).astype(jnp.float32))
    b2p = jnp.zeros((1, hid_p), jnp.float32).at[:, :hidden].set(
        b2.reshape(1, -1).astype(jnp.float32))
    # Zero padding is exact: padded hidden columns give ReLU(0)=0 and feed zero
    # rows of w2; padded output columns / batch rows are sliced off by the caller.
    return {"w1": w1p, "b1": b1p, "w2": w2p, "b2": b2p,
            "in_dim": in_dim, "hidden": hidden}


def mlp_expert(x, params, *, batch_tile=256, n_tile=None,
               out_dtype=jnp.bfloat16):
    """x: [B, input_dim]; params: output of prepare_mlp_expert_params().
    Returns [B, hidden] in out_dtype (bf16 default; f32 costs 2x writeback/VMEM)."""
    w1p, b1p, w2p, b2p = params["w1"], params["b1"], params["w2"], params["b2"]
    in_dim, hidden = params["in_dim"], params["hidden"]
    in_p, hid_p = w1p.shape
    B = x.shape[0]
    assert x.shape[1] == in_dim

    # ---- batch tile: multiple of 16 (bf16 packing), waste-aware ------------
    n_bt = max(1, -(-B // batch_tile))                 # ceil(B / batch_tile)
    bt = _round_up(-(-B // n_bt), BF16_SUBLANE)        # minimize padding waste
    B_p = _round_up(B, bt)

    # ---- pad / cast x only when actually needed ----------------------------
    if x.shape == (B_p, in_p) and x.dtype == jnp.bfloat16:
        xp = x
    else:
        xp = jnp.zeros((B_p, in_p), jnp.bfloat16).at[:B, :in_dim].set(
            x.astype(jnp.bfloat16))

    # ---- optional N-split over output hidden dim (v7x dual-TC / huge hidden)
    if n_tile is None:
        n_tile = hid_p                                  # single N tile by default
    n_tile = min(_round_up(n_tile, LANE), hid_p)
    assert hid_p % n_tile == 0
    grid = (B_p // bt, hid_p // n_tile)
    w2_const = grid[1] == 1                             # w2/b2 index constant?

    # ---- VMEM budget (weights single-buffered, x/out double-buffered) ------
    out_bytes = jnp.dtype(out_dtype).itemsize
    vmem_bytes = (
        2 * bt * in_p * 2                               # x tile (bf16), 2x
        + 2 * bt * n_tile * out_bytes                   # out tile, 2x
        + (in_p * hid_p + (1 if w2_const else 2) * hid_p * n_tile) * 2  # w1, w2
        + (hid_p + n_tile) * 4                          # biases (f32)
        + bt * (hid_p + n_tile) * 4                     # in-kernel f32 h / o temps
    )
    vmem_cap = _vmem_capacity_bytes()
    vmem_limit = int(min(max(int(1.5 * vmem_bytes), 4 << 20),
                         int(0.85 * vmem_cap)))
    # TODO(synk): when single-buffered weights exceed ~0.85*vmem_cap (hidden >= ~4K
    #             bf16; earlier on v7x's 64 MiB), add a K grid axis over w1/w2 with
    #             an f32 accumulator scratch instead of holding full weights.

    flops = 2 * B_p * (in_p * hid_p + hid_p * hid_p)
    bytes_accessed = (xp.size * 2 + w1p.size * 2 + w2p.size * 2
                      + (b1p.size + b2p.size) * 4 + B_p * hid_p * out_bytes)

    def _call(single_buffer_weights):
        in_specs = [
            _block_spec((bt, in_p), lambda i, j: (i, 0)),            # x (streamed)
            _block_spec((in_p, hid_p), lambda i, j: (0, 0),
                        single_buffer=single_buffer_weights),        # w1 (resident)
            _block_spec((1, hid_p), lambda i, j: (0, 0),
                        single_buffer=single_buffer_weights),        # b1
            _block_spec((hid_p, n_tile), lambda i, j: (0, j),
                        single_buffer=single_buffer_weights and w2_const),  # w2
            _block_spec((1, n_tile), lambda i, j: (0, j),
                        single_buffer=single_buffer_weights and w2_const),  # b2
        ]
        return pl.pallas_call(
            mlp_expert_kernel,
            out_shape=jax.ShapeDtypeStruct((B_p, hid_p), out_dtype),
            grid_spec=pltpu.PrefetchScalarGridSpec(
                num_scalar_prefetch=0,
                grid=grid,
                in_specs=in_specs,
                out_specs=pl.BlockSpec((bt, n_tile), lambda i, j: (i, j)),
            ),
            compiler_params=pltpu.CompilerParams(
                dimension_semantics=("parallel", "parallel"),
                vmem_limit_bytes=vmem_limit,
            ),
            cost_estimate=pl.CostEstimate(
                flops=int(flops), transcendentals=0,
                bytes_accessed=int(bytes_accessed)),
        )(xp, w1p, b1p, w2p, b2p)

    try:
        out_p = _call(True)
    except Exception:
        # Fallback: default double-buffered weights (older jax / Buffered(1) unsupported).
        out_p = _call(False)

    return out_p[:B, :hidden]


def init_params(key, input_dim, hidden_dim):
    """Synthetic init matching nn.Linear defaults (stored transposed [in, out])."""
    k1, k2, k3, k4 = jax.random.split(key, 4)
    bound1 = 1.0 / jnp.sqrt(input_dim)
    bound2 = 1.0 / jnp.sqrt(hidden_dim)
    w1 = jax.random.uniform(k1, (input_dim, hidden_dim), jnp.float32, -bound1, bound1)
    b1 = jax.random.uniform(k2, (1, hidden_dim), jnp.float32, -bound1, bound1)
    w2 = jax.random.uniform(k3, (hidden_dim, hidden_dim), jnp.float32, -bound2, bound2)
    b2 = jax.random.uniform(k4, (1, hidden_dim), jnp.float32, -bound2, bound2)
    return w1, b1, w2, b2


def mlp_expert_ref(x, w1, b1, w2, b2):
    h = jnp.maximum(x @ w1 + b1, 0.0)
    return jnp.maximum(h @ w2 + b2, 0.0)


if __name__ == "__main__":
    key = jax.random.PRNGKey(0)
    kx, kp = jax.random.split(key)

    batch, input_dim, hidden_dim = 16, 16, 32
    x = jax.random.normal(kx, (batch, input_dim), jnp.float32)
    w1, b1, w2, b2 = init_params(kp, input_dim, hidden_dim)

    # Hoisted, one-time weight prep (pad + bf16 cast) -- outside the call path.
    params = prepare_mlp_expert_params(w1, b1, w2, b2)

    out = mlp_expert(x, params)
    out = jax.block_until_ready(out)

    ref = mlp_expert_ref(x, w1, b1, w2, b2)
    assert out.shape == (batch, hidden_dim)
    # bf16 MXU inputs + bf16 output with f32 accumulation -> loose but meaningful tol.
    assert jnp.allclose(out.astype(jnp.float32), ref, atol=5e-2, rtol=5e-2), \
        "mismatch vs reference"

    print("KERNEL_OK")
</pallas_src>

<mosaic_0001>
module attributes {stable_mosaic.version = 11 : i64} {
  func.func @mlp_expert_kernel(%arg0: i32, %arg1: i32, %arg2: memref<16x128xbf16, #tpu.memory_space<vmem>>, %arg3: memref<128x128xbf16, #tpu.memory_space<vmem>>, %arg4: memref<1x128xf32, #tpu.memory_space<vmem>>, %arg5: memref<128x128xbf16, #tpu.memory_space<vmem>>, %arg6: memref<1x128xf32, #tpu.memory_space<vmem>>, %arg7: memref<16x128xbf16, #tpu.memory_space<vmem>>) attributes {dimension_semantics = [#tpu.dimension_semantics<parallel>, #tpu.dimension_semantics<parallel>], iteration_bounds = array<i64: 1, 1>, scalar_prefetch = 0 : i64, scratch_operands = 0 : i64, tpu.core_type = #tpu.core_type<tc>, window_params = [{transform_indices = @transform_0, window_bounds = array<i64: 16, 128>}, {pipeline_mode = #tpu.pipeline_mode<synchronous>, transform_indices = @transform_1, window_bounds = array<i64: 128, 128>}, {pipeline_mode = #tpu.pipeline_mode<synchronous>, transform_indices = @transform_2, window_bounds = array<i64: 1, 128>}, {pipeline_mode = #tpu.pipeline_mode<synchronous>, transform_indices = @transform_3, window_bounds = array<i64: 128, 128>}, {pipeline_mode = #tpu.pipeline_mode<synchronous>, transform_indices = @transform_4, window_bounds = array<i64: 1, 128>}, {transform_indices = @transform_5, window_bounds = array<i64: 16, 128>}]} {
    %c0 = arith.constant 0 : index
    %c0_0 = arith.constant 0 : index
    %0 = vector.load %arg2[%c0, %c0_0] : memref<16x128xbf16, #tpu.memory_space<vmem>>, vector<16x128xbf16>
    %c0_1 = arith.constant 0 : index
    %c0_2 = arith.constant 0 : index
    %1 = vector.load %arg3[%c0_1, %c0_2] : memref<128x128xbf16, #tpu.memory_space<vmem>>, vector<128x128xbf16>
    %cst = arith.constant dense<0.000000e+00> : vector<16x128xf32>
    %2 = tpu.matmul %0, %1, %cst {dimension_numbers = #tpu.dot_dimension_numbers<[1], [0], [0], [1], [0, 0, 1, 1], [], []>} : vector<16x128xbf16>, vector<128x128xbf16>, vector<16x128xf32> -> vector<16x128xf32>
    %c0_3 = arith.constant 0 : index
    %c0_4 = arith.constant 0 : index
    %3 = vector.load %arg4[%c0_3, %c0_4] : memref<1x128xf32, #tpu.memory_space<vmem>>, vector<1x128xf32>
    %4 = vector.broadcast %3 : vector<1x128xf32> to vector<16x128xf32>
    %5 = arith.addf %2, %4 : vector<16x128xf32>
    %cst_5 = arith.constant 0.000000e+00 : f32
    %6 = vector.broadcast %cst_5 : f32 to vector<16x128xf32>
    %7 = arith.maximumf %5, %6 : vector<16x128xf32>
    %8 = arith.truncf %7 : vector<16x128xf32> to vector<16x128xbf16>
    %c0_6 = arith.constant 0 : index
    %c0_7 = arith.constant 0 : index
    %9 = vector.load %arg5[%c0_6, %c0_7] : memref<128x128xbf16, #tpu.memory_space<vmem>>, vector<128x128xbf16>
    %cst_8 = arith.constant dense<0.000000e+00> : vector<16x128xf32>
    %10 = tpu.matmul %8, %9, %cst_8 {dimension_numbers = #tpu.dot_dimension_numbers<[1], [0], [0], [1], [0, 0, 1, 1], [], []>} : vector<16x128xbf16>, vector<128x128xbf16>, vector<16x128xf32> -> vector<16x128xf32>
    %c0_9 = arith.constant 0 : index
    %c0_10 = arith.constant 0 : index
    %11 = vector.load %arg6[%c0_9, %c0_10] : memref<1x128xf32, #tpu.memory_space<vmem>>, vector<1x128xf32>
    %12 = vector.broadcast %11 : vector<1x128xf32> to vector<16x128xf32>
    %13 = arith.addf %10, %12 : vector<16x128xf32>
    %cst_11 = arith.constant 0.000000e+00 : f32
    %14 = vector.broadcast %cst_11 : f32 to vector<16x128xf32>
    %15 = arith.maximumf %13, %14 : vector<16x128xf32>
    %16 = arith.truncf %15 : vector<16x128xf32> to vector<16x128xbf16>
    %c0_12 = arith.constant 0 : index
    %c0_13 = arith.constant 0 : index
    %17 = vector.load %arg7[%c0_12, %c0_13] : memref<16x128xbf16, #tpu.memory_space<vmem>>, vector<16x128xbf16>
    tpu.vector_store %arg7[%c0_12, %c0_13], %16 {strides = array<i32>} : memref<16x128xbf16, #tpu.memory_space<vmem>>, vector<16x128xbf16>,
    return
  }
  func.func @transform_0(%arg0: i32, %arg1: i32) -> (i32, i32) {
    %c0_i32 = arith.constant 0 : i32
    %c0_i32_0 = arith.constant 0 : i32
    return %arg0, %c0_i32 : i32, i32
  }
  func.func @transform_1(%arg0: i32, %arg1: i32) -> (i32, i32) {
    %c0_i32 = arith.constant 0 : i32
    %c0_i32_0 = arith.constant 0 : i32
    %c0_i32_1 = arith.constant 0 : i32
    return %c0_i32, %c0_i32_0 : i32, i32
  }
  func.func @transform_2(%arg0: i32, %arg1: i32) -> (i32, i32) {
    %c0_i32 = arith.constant 0 : i32
    %c0_i32_0 = arith.constant 0 : i32
    %c0_i32_1 = arith.constant 0 : i32
    return %c0_i32, %c0_i32_0 : i32, i32
  }
  func.func @transform_3(%arg0: i32, %arg1: i32) -> (i32, i32) {
    %c0_i32 = arith.constant 0 : i32
    %c0_i32_0 = arith.constant 0 : i32
    return %c0_i32, %arg1 : i32, i32
  }
  func.func @transform_4(%arg0: i32, %arg1: i32) -> (i32, i32) {
    %c0_i32 = arith.constant 0 : i32
    %c0_i32_0 = arith.constant 0 : i32
    return %c0_i32, %arg1 : i32, i32
  }
  func.func @transform_5(%arg0: i32, %arg1: i32) -> (i32, i32) {
    %c0_i32 = arith.constant 0 : i32
    return %arg0, %arg1 : i32, i32
  }
}

module attributes {stable_mosaic.version = 11 : i64} {
  func.func @mlp_expert_kernel(%arg0: i32, %arg1: i32, %arg2: memref<16x128xbf16, #tpu.memory_space<vmem>>, %arg3: memref<128x128xbf16, #tpu.memory_space<vmem>>, %arg4: memref<1x128xf32, #tpu.memory_space<vmem>>, %arg5: memref<128x128xbf16, #tpu.memory_space<vmem>>, %arg6: memref<1x128xf32, #tpu.memory_space<vmem>>, %arg7: memref<16x128xbf16, #tpu.memory_space<vmem>>) attributes {dimension_semantics = [#tpu.dimension_semantics<parallel>, #tpu.dimension_semantics<parallel>], iteration_bounds = array<i64: 1, 1>, scalar_prefetch = 0 : i64, scratch_operands = 0 : i64, tpu.core_type = #tpu.core_type<tc>, window_params = [{transform_indices = @transform_0, window_bounds = array<i64: 16, 128>}, {pipeline_mode = #tpu.pipeline_mode<synchronous>, transform_indices = @transform_1, window_bounds = array<i64: 128, 128>}, {pipeline_mode = #tpu.pipeline_mode<synchronous>, transform_indices = @transform_2, window_bounds = array<i64: 1, 128>}, {transform_indices = @transform_3, window_bounds = array<i64: 128, 128>}, {transform_indices = @transform_4, window_bounds = array<i64: 1, 128>}, {transform_indices = @transform_5, window_bounds = array<i64: 16, 128>}]} {
    %c0 = arith.constant 0 : index
    %c0_0 = arith.constant 0 : index
    %0 = vector.load %arg2[%c0, %c0_0] : memref<16x128xbf16, #tpu.memory_space<vmem>>, vector<16x128xbf16>
    %c0_1 = arith.constant 0 : index
    %c0_2 = arith.constant 0 : index
    %1 = vector.load %arg3[%c0_1, %c0_2] : memref<128x128xbf16, #tpu.memory_space<vmem>>, vector<128x128xbf16>
    %cst = arith.constant dense<0.000000e+00> : vector<16x128xf32>
    %2 = tpu.matmul %0, %1, %cst {dimension_numbers = #tpu.dot_dimension_numbers<[1], [0], [0], [1], [0, 0, 1, 1], [], []>} : vector<16x128xbf16>, vector<128x128xbf16>, vector<16x128xf32> -> vector<16x128xf32>
    %c0_3 = arith.constant 0 : index
    %c0_4 = arith.constant 0 : index
    %3 = vector.load %arg4[%c0_3, %c0_4] : memref<1x128xf32, #tpu.memory_space<vmem>>, vector<1x128xf32>
    %4 = vector.broadcast %3 : vector<1x128xf32> to vector<16x128xf32>
    %5 = arith.addf %2, %4 : vector<16x128xf32>
    %cst_5 = arith.constant 0.000000e+00 : f32
    %6 = vector.broadcast %cst_5 : f32 to vector<16x128xf32>
    %7 = arith.maximumf %5, %6 : vector<16x128xf32>
    %8 = arith.truncf %7 : vector<16x128xf32> to vector<16x128xbf16>
    %c0_6 = arith.constant 0 : index
    %c0_7 = arith.constant 0 : index
    %9 = vector.load %arg5[%c0_6, %c0_7] : memref<128x128xbf16, #tpu.memory_space<vmem>>, vector<128x128xbf16>
    %cst_8 = arith.constant dense<0.000000e+00> : vector<16x128xf32>
    %10 = tpu.matmul %8, %9, %cst_8 {dimension_numbers = #tpu.dot_dimension_numbers<[1], [0], [0], [1], [0, 0, 1, 1], [], []>} : vector<16x128xbf16>, vector<128x128xbf16>, vector<16x128xf32> -> vector<16x128xf32>
    %c0_9 = arith.constant 0 : index
    %c0_10 = arith.constant 0 : index
    %11 = vector.load %arg6[%c0_9, %c0_10] : memref<1x128xf32, #tpu.memory_space<vmem>>, vector<1x128xf32>
    %12 = vector.broadcast %11 : vector<1x128xf32> to vector<16x128xf32>
    %13 = arith.addf %10, %12 : vector<16x128xf32>
    %cst_11 = arith.constant 0.000000e+00 : f32
    %14 = vector.broadcast %cst_11 : f32 to vector<16x128xf32>
    %15 = arith.maximumf %13, %14 : vector<16x128xf32>
    %16 = arith.truncf %15 : vector<16x128xf32> to vector<16x128xbf16>
    %c0_12 = arith.constant 0 : index
    %c0_13 = arith.constant 0 : index
    %17 = vector.load %arg7[%c0_12, %c0_13] : memref<16x128xbf16, #tpu.memory_space<vmem>>, vector<16x128xbf16>
    tpu.vector_store %arg7[%c0_12, %c0_13], %16 {strides = array<i32>} : memref<16x128xbf16, #tpu.memory_space<vmem>>, vector<16x128xbf16>,
    return
  }
  func.func @transform_0(%arg0: i32, %arg1: i32) -> (i32, i32) {
    %c0_i32 = arith.constant 0 : i32
    %c0_i32_0 = arith.constant 0 : i32
    return %arg0, %c0_i32 : i32, i32
  }
  func.func @transform_1(%arg0: i32, %arg1: i32) -> (i32, i32) {
    %c0_i32 = arith.constant 0 : i32
    %c0_i32_0 = arith.constant 0 : i32
    %c0_i32_1 = arith.constant 0 : i32
    return %c0_i32, %c0_i32_0 : i32, i32
  }
  func.func @transform_2(%arg0: i32, %arg1: i32) -> (i32, i32) {
    %c0_i32 = arith.constant 0 : i32
    %c0_i32_0 = arith.constant 0 : i32
    %c0_i32_1 = arith.constant 0 : i32
    return %c0_i32, %c0_i32_0 : i32, i32
  }
  func.func @transform_3(%arg0: i32, %arg1: i32) -> (i32, i32) {
    %c0_i32 = arith.constant 0 : i32
    %c0_i32_0 = arith.constant 0 : i32
    return %c0_i32, %arg1 : i32, i32
  }
  func.func @transform_4(%arg0: i32, %arg1: i32) -> (i32, i32) {
    %c0_i32 = arith.constant 0 : i32
    %c0_i32_0 = arith.constant 0 : i32
    return %c0_i32, %arg1 : i32, i32
  }
  func.func @transform_5(%arg0: i32, %arg1: i32) -> (i32, i32) {
    %c0_i32 = arith.constant 0 : i32
    return %arg0, %arg1 : i32, i32
  }
}

</mosaic_0001>

<bundles_post_ra>
// kernel: tpu_custom_call.1
= control target key start
LH: loop header
LB: loop body
LE: loop exit
PB: predicated region body
PF: predicated region fallthrough
CT: control target
= control target key end

     0   :  { %10 = vsyncpa [#allocation3], 0  ;;  %s644_s0 = inlined_call_operand.hbm [shape: bf16[16,128], index: 0, kind: input, shape index: {}]   ;;  %s645_s1 = inlined_call_operand.hbm [shape: bf16[128,128], index: 1, kind: input, shape index: {}]   ;;  %s646_s2 = inlined_call_operand.vmem [shape: f32[1,128], index: 2, kind: input, shape index: {}]   ;;  %s647_s3 = inlined_call_operand.hbm [shape: bf16[128,128], index: 3, kind: input, shape index: {}]   ;;  %s648_s4 = inlined_call_operand.vmem [shape: f32[1,128], index: 4, kind: input, shape index: {}]   ;;  %s649_s5 = inlined_call_operand.hbm [shape: bf16[16,128], index: 5, kind: output, shape index: {}]  }
   0x1   :  { %11 = vsyncpa [#allocation6], 0 }
   0x2   :  { %12 = vsyncpa [#allocation4], 0  ;;  %s533_s18 = smov [#allocation5]   ;;  %s534_s20 = smov [#allocation2]  }
   0x3   :  { %s30_s19 = sshll.u32 %s533_s18, 4  ;;  %s18_s21 = sshll.u32 %s534_s20, 4  ;;  %s31_s19 = int_to_ptr.vmem [resolvable:$true] %s30_s19  ;;  %s571_s21 = int_to_ptr.vmem [resolvable:$true] %s18_s21 }
   0x4   :  { %s439_s24 = scalar_lea.hbm %s645_s1, 1024 }
   0x5   :  { %p440_p0 = scmp.ne.s32.totalorder %s645_s1, %s439_s24  ;;  %p443_p1 = scmp.lt.u32.totalorder %s439_s24, %s645_s1 }
   0x7   :  { %p445_p2 = pnand %p443_p1, %p440_p0 }
   0x9   :  { %448 = shalt.err (!%p445_p2)
}
   0xa   :  { %s449_s29 = scalar_lea.vmem %s31_s19, 1024  ;;  %p454_p4 = scmp.lt.s32.totalorder %s31_s19, %s31_s19 }
   0xb   :  { %p450_p3 = scmp.ne.s32.totalorder %s31_s19, %s449_s29  ;;  %p455_p5 = scmp.lt.s32.totalorder %s449_s29, %s449_s29 }
   0xd   :  { %p456_p6 = por %p455_p5, %p454_p4 }
   0xf   :  { %p457_p7 = pnand %p456_p6, %p450_p3 }
  0x11   :  { %460 = shalt.err (!%p457_p7)
}
  0x12   :  { %s535_s30 = smov 64   ;;  %s536_s6 = smov 4  }
  0x13   :  { %36 = dma.hbm_to_vmem [thread:$0]  %s645_s1, 1024, %s31_s19, [#allocation6], %s535_s30, %s535_s30, %s536_s6  }
  0x14   :  { %s461_s11 = scalar_lea.hbm %s644_s0, 128 }
  0x15   :  { %p462_p8 = scmp.ne.s32.totalorder %s644_s0, %s461_s11  ;;  %p465_p9 = scmp.lt.u32.totalorder %s461_s11, %s644_s0 }
  0x17   :  { %p467_p10 = pnand %p465_p9, %p462_p8 }
  0x19   :  { %470 = shalt.err (!%p467_p10)
}
  0x1a   :  { %s471_s16 = scalar_lea.vmem %s571_s21, 128  ;;  %p476_p12 = scmp.lt.s32.totalorder %s571_s21, %s571_s21 }
  0x1b   :  { %p472_p11 = scmp.ne.s32.totalorder %s571_s21, %s471_s16  ;;  %p477_p13 = scmp.lt.s32.totalorder %s471_s16, %s471_s16 }
  0x1d   :  { %p478_p0 = por %p477_p13, %p476_p12 }
  0x1f   :  { %p479_p1 = pnand %p478_p0, %p472_p11 }
  0x21   :  { %482 = shalt.err (!%p479_p1)
}
  0x22   :  { %24 = dma.hbm_to_vmem [thread:$0]  %s644_s0, 128, %s571_s21, [#allocation3], %s535_s30, %s535_s30, %s536_s6  }
  0x23   :  { %s537_s18 = smov [#allocation7]   ;;  %s483_s23 = scalar_lea.hbm %s647_s3, 1024 }
  0x24   :  { %s44_s19 = sshll.u32 %s537_s18, 4  ;;  %p484_p2 = scmp.ne.s32.totalorder %s647_s3, %s483_s23  ;;  %s45_s19 = int_to_ptr.vmem [resolvable:$true] %s44_s19 }
  0x25   :  { %p487_p3 = scmp.lt.u32.totalorder %s483_s23, %s647_s3 }
  0x27   :  { %p489_p4 = pnand %p487_p3, %p484_p2 }
  0x29   :  { %492 = shalt.err (!%p489_p4)
}
  0x2a   :  { %s493_s28 = scalar_lea.vmem %s45_s19, 1024  ;;  %p498_p6 = scmp.lt.s32.totalorder %s45_s19, %s45_s19 }
  0x2b   :  { %p494_p5 = scmp.ne.s32.totalorder %s45_s19, %s493_s28  ;;  %p499_p7 = scmp.lt.s32.totalorder %s493_s28, %s493_s28 }
  0x2d   :  { %p500_p8 = por %p499_p7, %p498_p6 }
  0x2f   :  { %p501_p9 = pnand %p500_p8, %p494_p5 }
  0x31   :  { %504 = shalt.err (!%p501_p9)
}
  0x32   :  { %50 = dma.hbm_to_vmem [thread:$0]  %s647_s3, 1024, %s45_s19, [#allocation6], %s535_s30, %s535_s30, %s536_s6  }
  0x33   :  { %527 = dma.done.wait [#allocation3], 128  }
  0x34   :  { %528 = vsyncadd [#allocation3], 4294967168 }
  0x35   :  { %529 = dma.done.wait [#allocation6], 2048  }
  0x36   :  { %530 = vsyncadd [#allocation6], 4294965248  ;;  %v538_v0 = vmov 0.0   ;;  %vm539_vm0 = vmmov 0   ;;  %v422_v1 = vld [vmem:[#allocation5] sm:$0xff]   ;;  %v423_v2 = vld [vmem:[#allocation5 + $0x8] sm:$0xff]  }
  0x37   :  { %374 = vmatprep.subr.bf16.mxu0 %v538_v0  ;;  %390 = vmatprep.mubr.msk.bf16.mxu0 %vm539_vm0, %v538_v0  ;;  %v424_v3 = vld [vmem:[#allocation5 + $0x10] sm:$0xff]   ;;  %v431_v4 = vld [vmem:[#allocation7] sm:$0xff]   ;;  %v425_v5 = vld [vmem:[#allocation5 + $0x18] sm:$0xff]  }
  0x38   :  { %394 = vmatprep.subr.bf16.mxu1 %v538_v0  ;;  %410 = vmatprep.mubr.msk.bf16.mxu1 %vm539_vm0, %v538_v0  ;;  %v432_v6 = vld [vmem:[#allocation7 + $0x8] sm:$0xff]   ;;  %v426_v7 = vld [vmem:[#allocation5 + $0x20] sm:$0xff]   ;;  %v433_v8 = vld [vmem:[#allocation7 + $0x10] sm:$0xff]  }
  0x39   :  { %375 = vmatpush3.bf16.msra.mxu0 %v422_v1  ;;  %395 = vmatpush3.bf16.msra.mxu1 %v431_v4  ;;  %v427_v9 = vld [vmem:[#allocation5 + $0x28] sm:$0xff]   ;;  %v434_v10 = vld [vmem:[#allocation7 + $0x18] sm:$0xff]   ;;  %v428_v11 = vld [vmem:[#allocation5 + $0x30] sm:$0xff]  }
  0x3a   :  { %376 = vmatprep.subr.bf16.mxu0 %v538_v0  ;;  %396 = vmatprep.subr.bf16.mxu1 %v538_v0  ;;  %v435_v12 = vld [vmem:[#allocation7 + $0x20] sm:$0xff]   ;;  %v429_v13 = vld [vmem:[#allocation5 + $0x38] sm:$0xff]   ;;  %v436_v14 = vld [vmem:[#allocation7 + $0x28] sm:$0xff]  }
  0x3b   :  { %v430_v15 = vld [vmem:[#allocation2] sm:$0xff]   ;;  %v437_v16 = vld [vmem:[#allocation7 + $0x30] sm:$0xff]  }
  0x3c   :  { %v438_v17 = vld [vmem:[#allocation7 + $0x38] sm:$0xff]  }
  0x3d   :  { %377 = vmatpush3.bf16.msra.mxu0 %v423_v2  ;;  %397 = vmatpush3.bf16.msra.mxu1 %v432_v6  ;;  %v328_v18 = vld [vmem:[%s646_s2] ss:$0 sm:$0xff]  ;;  %s540_s2 = smov [#allocation8]  }
  0x3e   :  { %378 = vmatprep.subr.bf16.mxu0 %v538_v0  ;;  %398 = vmatprep.subr.bf16.mxu1 %v538_v0  ;;  %v338_v28 = vld [vmem:[%s648_s4] ss:$0 sm:$0xff]  ;;  %s315_s9 = sshll.u32 %s540_s2, 4  ;;  %s316_s9 = int_to_ptr.vmem [resolvable:$true] %s315_s9 }
  0x3f   :  { %s505_s10 = scalar_lea.vmem %s316_s9, 128  ;;  %p510_p11 = scmp.lt.s32.totalorder %s316_s9, %s316_s9 }
  0x40   :  { %p506_p10 = scmp.ne.s32.totalorder %s316_s9, %s505_s10  ;;  %p511_p12 = scmp.lt.s32.totalorder %s505_s10, %s505_s10 }
  0x41   :  { %379 = vmatpush3.bf16.msra.mxu0 %v424_v3  ;;  %399 = vmatpush3.bf16.msra.mxu1 %v433_v8 }
  0x42   :  { %380 = vmatprep.subr.bf16.mxu0 %v538_v0  ;;  %400 = vmatprep.subr.bf16.mxu1 %v538_v0  ;;  %p512_p13 = por %p511_p12, %p510_p11 }
  0x44   :  { %p513_p0 = pnand %p512_p13, %p506_p10 }
  0x45   :  { %381 = vmatpush3.bf16.msra.mxu0 %v425_v5  ;;  %401 = vmatpush3.bf16.msra.mxu1 %v434_v10 }
  0x46   :  { %382 = vmatprep.subr.bf16.mxu0 %v538_v0  ;;  %402 = vmatprep.subr.bf16.mxu1 %v538_v0 }
  0x49   :  { %383 = vmatpush3.bf16.msra.mxu0 %v426_v7  ;;  %403 = vmatpush3.bf16.msra.mxu1 %v435_v12 }
  0x4a   :  { %384 = vmatprep.subr.bf16.mxu0 %v538_v0  ;;  %404 = vmatprep.subr.bf16.mxu1 %v538_v0 }
  0x4d   :  { %385 = vmatpush3.bf16.msra.mxu0 %v427_v9  ;;  %405 = vmatpush3.bf16.msra.mxu1 %v436_v14 }
  0x4e   :  { %386 = vmatprep.subr.bf16.mxu0 %v538_v0  ;;  %406 = vmatprep.subr.bf16.mxu1 %v538_v0 }
  0x51   :  { %387 = vmatpush3.bf16.msra.mxu0 %v428_v11  ;;  %407 = vmatpush3.bf16.msra.mxu1 %v437_v16 }
  0x52   :  { %388 = vmatprep.subr.bf16.mxu0 %v538_v0  ;;  %408 = vmatprep.subr.bf16.mxu1 %v538_v0 }
  0x55   :  { %389 = vmatpush3.bf16.msra.mxu0 %v429_v13  ;;  %409 = vmatpush3.bf16.msra.mxu1 %v438_v17 }
  0x58   :  { %391 = vmatmul.mubr.bf16.vlgmr.msra.gmra.mrb[0].mxu0 %v430_v15 }
 0x12b   :  { %v176_v19 = vpop.f32.mrb[0].mxu0 }
 0x12c   :  { %v177_v20 = vadd.f32 %v328_v18, %v176_v19  ;;  %v392_v21 = vpop.f32.mrb[1].mxu0 }
 0x12d   :  { %v179_v22 = vpop.f32.mrb[2].mxu0 }
 0x12e   :  { %v180_v23 = vadd.f32 %v328_v18, %v179_v22  ;;  %v393_v24 = vpop.f32.mrb[3].mxu0  ;;  %v183_v25 = vmax.f32 %v177_v20, 0.0 }
 0x130   :  { %v184_v26 = vmax.f32 %v180_v23, 0.0 }
 0x132   :  { %v185_v27 = vpack.c.bf16 %v184_v26, %v183_v25 }
 0x134   :  { %411 = vmatmul.mubr.bf16.vlgmr.msra.gmra.mrb[0].mxu1 %v185_v27 }
 0x207   :  { %v291_v29 = vpop.f32.mrb[0].mxu1 }
 0x208   :  { %v292_v30 = vadd.f32 %v338_v28, %v291_v29  ;;  %v412_v31 = vpop.f32.mrb[1].mxu1 }
 0x209   :  { %v294_v32 = vpop.f32.mrb[2].mxu1 }
 0x20a   :  { %v295_v33 = vadd.f32 %v338_v28, %v294_v32  ;;  %v413_v34 = vpop.f32.mrb[3].mxu1  ;;  %v298_v35 = vmax.f32 %v292_v30, 0.0 }
 0x20c   :  { %v299_v36 = vmax.f32 %v295_v33, 0.0 }
 0x20e   :  { %v354_v37 = vpack.c.bf16 %v299_v36, %v298_v35 }
 0x210   :  { %355 = vst [vmem:[#allocation8] sm:$0xff] %v354_v37  }
 0x211   :  { %516 = shalt.err (!%p513_p0)
}
 0x212   :  { %s517_s12 = scalar_lea.hbm %s649_s5, 128 }
 0x213   :  { %p518_p1 = scmp.ne.s32.totalorder %s649_s5, %s517_s12  ;;  %p521_p2 = scmp.lt.u32.totalorder %s517_s12, %s649_s5 }
 0x215   :  { %p523_p3 = pnand %p521_p2, %p518_p1 }
 0x217   :  { %526 = shalt.err (!%p523_p3)
}
 0x218   :  { %321 = dma.vmem_to_hbm [thread:$0]  %s316_s9, 128, %s649_s5, [#allocation4], %s535_s30, %s535_s30, %s536_s6  }
 0x219   :  { %531 = dma.done.wait [#allocation4], 128  }
 0x21a   :  { %532 = vsyncadd [#allocation4], 4294967168 }
 0x21b   :  { %325 = vsyncpa [#allocation3], 1 }
 0x21c   :  { %326 = vsyncpa [#allocation6], 1 }
 0x21d   :  { %327 = vsyncpa [#allocation4], 1 }

// kernel: tpu_custom_call.1
= control target key start
LH: loop header
LB: loop body
LE: loop exit
PB: predicated region body
PF: predicated region fallthrough
CT: control target
= control target key end

     0   :  { %10 = vsyncpa [#allocation3], 0  ;;  %s644_s0 = inlined_call_operand.hbm [shape: bf16[16,128], index: 0, kind: input, shape index: {}]   ;;  %s645_s1 = inlined_call_operand.hbm [shape: bf16[128,128], index: 1, kind: input, shape index: {}]   ;;  %s646_s2 = inlined_call_operand.vmem [shape: f32[1,128], index: 2, kind: input, shape index: {}]   ;;  %s647_s3 = inlined_call_operand.hbm [shape: bf16[128,128], index: 3, kind: input, shape index: {}]   ;;  %s648_s4 = inlined_call_operand.vmem [shape: f32[1,128], index: 4, kind: input, shape index: {}]   ;;  %s649_s5 = inlined_call_operand.hbm [shape: bf16[16,128], index: 5, kind: output, shape index: {}]  }
   0x1   :  { %11 = vsyncpa [#allocation6], 0 }
   0x2   :  { %12 = vsyncpa [#allocation4], 0  ;;  %s533_s18 = smov [#allocation5]   ;;  %s534_s20 = smov [#allocation2]  }
   0x3   :  { %s30_s19 = sshll.u32 %s533_s18, 4  ;;  %s18_s21 = sshll.u32 %s534_s20, 4  ;;  %s31_s19 = int_to_ptr.vmem [resolvable:$true] %s30_s19  ;;  %s571_s21 = int_to_ptr.vmem [resolvable:$true] %s18_s21 }
   0x4   :  { %s439_s24 = scalar_lea.hbm %s645_s1, 1024 }
   0x5   :  { %p440_p0 = scmp.ne.s32.totalorder %s645_s1, %s439_s24  ;;  %p443_p1 = scmp.lt.u32.totalorder %s439_s24, %s645_s1 }
   0x7   :  { %p445_p2 = pnand %p443_p1, %p440_p0 }
   0x9   :  { %448 = shalt.err (!%p445_p2)
}
   0xa   :  { %s449_s29 = scalar_lea.vmem %s31_s19, 1024  ;;  %p454_p4 = scmp.lt.s32.totalorder %s31_s19, %s31_s19 }
   0xb   :  { %p450_p3 = scmp.ne.s32.totalorder %s31_s19, %s449_s29  ;;  %p455_p5 = scmp.lt.s32.totalorder %s449_s29, %s449_s29 }
   0xd   :  { %p456_p6 = por %p455_p5, %p454_p4 }
   0xf   :  { %p457_p7 = pnand %p456_p6, %p450_p3 }
  0x11   :  { %460 = shalt.err (!%p457_p7)
}
  0x12   :  { %s535_s30 = smov 64   ;;  %s536_s6 = smov 4  }
  0x13   :  { %36 = dma.hbm_to_vmem [thread:$0]  %s645_s1, 1024, %s31_s19, [#allocation6], %s535_s30, %s535_s30, %s536_s6  }
  0x14   :  { %s461_s11 = scalar_lea.hbm %s644_s0, 128 }
  0x15   :  { %p462_p8 = scmp.ne.s32.totalorder %s644_s0, %s461_s11  ;;  %p465_p9 = scmp.lt.u32.totalorder %s461_s11, %s644_s0 }
  0x17   :  { %p467_p10 = pnand %p465_p9, %p462_p8 }
  0x19   :  { %470 = shalt.err (!%p467_p10)
}
  0x1a   :  { %s471_s16 = scalar_lea.vmem %s571_s21, 128  ;;  %p476_p12 = scmp.lt.s32.totalorder %s571_s21, %s571_s21 }
  0x1b   :  { %p472_p11 = scmp.ne.s32.totalorder %s571_s21, %s471_s16  ;;  %p477_p13 = scmp.lt.s32.totalorder %s471_s16, %s471_s16 }
  0x1d   :  { %p478_p0 = por %p477_p13, %p476_p12 }
  0x1f   :  { %p479_p1 = pnand %p478_p0, %p472_p11 }
  0x21   :  { %482 = shalt.err (!%p479_p1)
}
  0x22   :  { %24 = dma.hbm_to_vmem [thread:$0]  %s644_s0, 128, %s571_s21, [#allocation3], %s535_s30, %s535_s30, %s536_s6  }
  0x23   :  { %s537_s18 = smov [#allocation7]   ;;  %s483_s23 = scalar_lea.hbm %s647_s3, 1024 }
  0x24   :  { %s44_s19 = sshll.u32 %s537_s18, 4  ;;  %p484_p2 = scmp.ne.s32.totalorder %s647_s3, %s483_s23  ;;  %s45_s19 = int_to_ptr.vmem [resolvable:$true] %s44_s19 }
  0x25   :  { %p487_p3 = scmp.lt.u32.totalorder %s483_s23, %s647_s3 }
  0x27   :  { %p489_p4 = pnand %p487_p3, %p484_p2 }
  0x29   :  { %492 = shalt.err (!%p489_p4)
}
  0x2a   :  { %s493_s28 = scalar_lea.vmem %s45_s19, 1024  ;;  %p498_p6 = scmp.lt.s32.totalorder %s45_s19, %s45_s19 }
  0x2b   :  { %p494_p5 = scmp.ne.s32.totalorder %s45_s19, %s493_s28  ;;  %p499_p7 = scmp.lt.s32.totalorder %s493_s28, %s493_s28 }
  0x2d   :  { %p500_p8 = por %p499_p7, %p498_p6 }
  0x2f   :  { %p501_p9 = pnand %p500_p8, %p494_p5 }
  0x31   :  { %504 = shalt.err (!%p501_p9)
}
  0x32   :  { %50 = dma.hbm_to_vmem [thread:$0]  %s647_s3, 1024, %s45_s19, [#allocation6], %s535_s30, %s535_s30, %s536_s6  }
  0x33   :  { %527 = dma.done.wait [#allocation3], 128  }
  0x34   :  { %528 = vsyncadd [#allocation3], 4294967168 }
  0x35   :  { %529 = dma.done.wait [#allocation6], 2048  }
  0x36   :  { %530 = vsyncadd [#allocation6], 4294965248  ;;  %v538_v0 = vmov 0.0   ;;  %vm539_vm0 = vmmov 0   ;;  %v422_v1 = vld [vmem:[#allocation5] sm:$0xff]   ;;  %v423_v2 = vld [vmem:[#allocation5 + $0x8] sm:$0xff]  }
  0x37   :  { %374 = vmatprep.subr.bf16.mxu0 %v538_v0  ;;  %390 = vmatprep.mubr.msk.bf16.mxu0 %vm539_vm0, %v538_v0  ;;  %v424_v3 = vld [vmem:[#allocation5 + $0x10] sm:$0xff]   ;;  %v431_v4 = vld [vmem:[#allocation7] sm:$0xff]   ;;  %v425_v5 = vld [vmem:[#allocation5 + $0x18] sm:$0xff]  }
  0x38   :  { %394 = vmatprep.subr.bf16.mxu1 %v538_v0  ;;  %410 = vmatprep.mubr.msk.bf16.mxu1 %vm539_vm0, %v538_v0  ;;  %v432_v6 = vld [vmem:[#allocation7 + $0x8] sm:$0xff]   ;;  %v426_v7 = vld [vmem:[#allocation5 + $0x20] sm:$0xff]   ;;  %v433_v8 = vld [vmem:[#allocation7 + $0x10] sm:$0xff]  }
  0x39   :  { %375 = vmatpush3.bf16.msra.mxu0 %v422_v1  ;;  %395 = vmatpush3.bf16.msra.mxu1 %v431_v4  ;;  %v427_v9 = vld [vmem:[#allocation5 + $0x28] sm:$0xff]   ;;  %v434_v10 = vld [vmem:[#allocation7 + $0x18] sm:$0xff]   ;;  %v428_v11 = vld [vmem:[#allocation5 + $0x30] sm:$0xff]  }
  0x3a   :  { %376 = vmatprep.subr.bf16.mxu0 %v538_v0  ;;  %396 = vmatprep.subr.bf16.mxu1 %v538_v0  ;;  %v435_v12 = vld [vmem:[#allocation7 + $0x20] sm:$0xff]   ;;  %v429_v13 = vld [vmem:[#allocation5 + $0x38] sm:$0xff]   ;;  %v436_v14 = vld [vmem:[#allocation7 + $0x28] sm:$0xff]  }
  0x3b   :  { %v430_v15 = vld [vmem:[#allocation2] sm:$0xff]   ;;  %v437_v16 = vld [vmem:[#allocation7 + $0x30] sm:$0xff]  }
  0x3c   :  { %v438_v17 = vld [vmem:[#allocation7 + $0x38] sm:$0xff]  }
  0x3d   :  { %377 = vmatpush3.bf16.msra.mxu0 %v423_v2  ;;  %397 = vmatpush3.bf16.msra.mxu1 %v432_v6  ;;  %v328_v18 = vld [vmem:[%s646_s2] ss:$0 sm:$0xff]  ;;  %s540_s2 = smov [#allocation8]  }
  0x3e   :  { %378 = vmatprep.subr.bf16.mxu0 %v538_v0  ;;  %398 = vmatprep.subr.bf16.mxu1 %v538_v0  ;;  %v338_v28 = vld [vmem:[%s648_s4] ss:$0 sm:$0xff]  ;;  %s315_s9 = sshll.u32 %s540_s2, 4  ;;  %s316_s9 = int_to_ptr.vmem [resolvable:$true] %s315_s9 }
  0x3f   :  { %s505_s10 = scalar_lea.vmem %s316_s9, 128  ;;  %p510_p11 = scmp.lt.s32.totalorder %s316_s9, %s316_s9 }
  0x40   :  { %p506_p10 = scmp.ne.s32.totalorder %s316_s9, %s505_s10  ;;  %p511_p12 = scmp.lt.s32.totalorder %s505_s10, %s505_s10 }
  0x41   :  { %379 = vmatpush3.bf16.msra.mxu0 %v424_v3  ;;  %399 = vmatpush3.bf16.msra.mxu1 %v433_v8 }
  0x42   :  { %380 = vmatprep.subr.bf16.mxu0 %v538_v0  ;;  %400 = vmatprep.subr.bf16.mxu1 %v538_v0  ;;  %p512_p13 = por %p511_p12, %p510_p11 }
  0x44   :  { %p513_p0 = pnand %p512_p13, %p506_p10 }
  0x45   :  { %381 = vmatpush3.bf16.msra.mxu0 %v425_v5  ;;  %401 = vmatpush3.bf16.msra.mxu1 %v434_v10 }
  0x46   :  { %382 = vmatprep.subr.bf16.mxu0 %v538_v0  ;;  %402 = vmatprep.subr.bf16.mxu1 %v538_v0 }
  0x49   :  { %383 = vmatpush3.bf16.msra.mxu0 %v426_v7  ;;  %403 = vmatpush3.bf16.msra.mxu1 %v435_v12 }
  0x4a   :  { %384 = vmatprep.subr.bf16.mxu0 %v538_v0  ;;  %404 = vmatprep.subr.bf16.mxu1 %v538_v0 }
  0x4d   :  { %385 = vmatpush3.bf16.msra.mxu0 %v427_v9  ;;  %405 = vmatpush3.bf16.msra.mxu1 %v436_v14 }
  0x4e   :  { %386 = vmatprep.subr.bf16.mxu0 %v538_v0  ;;  %406 = vmatprep.subr.bf16.mxu1 %v538_v0 }
  0x51   :  { %387 = vmatpush3.bf16.msra.mxu0 %v428_v11  ;;  %407 = vmatpush3.bf16.msra.mxu1 %v437_v16 }
  0x52   :  { %388 = vmatprep.subr.bf16.mxu0 %v538_v0  ;;  %408 = vmatprep.subr.bf16.mxu1 %v538_v0 }
  0x55   :  { %389 = vmatpush3.bf16.msra.mxu0 %v429_v13  ;;  %409 = vmatpush3.bf16.msra.mxu1 %v438_v17 }
  0x58   :  { %391 = vmatmul.mubr.bf16.vlgmr.msra.gmra.mrb[0].mxu0 %v430_v15 }
 0x12b   :  { %v176_v19 = vpop.f32.mrb[0].mxu0 }
 0x12c   :  { %v177_v20 = vadd.f32 %v328_v18, %v176_v19  ;;  %v392_v21 = vpop.f32.mrb[1].mxu0 }
 0x12d   :  { %v179_v22 = vpop.f32.mrb[2].mxu0 }
 0x12e   :  { %v180_v23 = vadd.f32 %v328_v18, %v179_v22  ;;  %v393_v24 = vpop.f32.mrb[3].mxu0  ;;  %v183_v25 = vmax.f32 %v177_v20, 0.0 }
 0x130   :  { %v184_v26 = vmax.f32 %v180_v23, 0.0 }
 0x132   :  { %v185_v27 = vpack.c.bf16 %v184_v26, %v183_v25 }
 0x134   :  { %411 = vmatmul.mubr.bf16.vlgmr.msra.gmra.mrb[0].mxu1 %v185_v27 }
 0x207   :  { %v291_v29 = vpop.f32.mrb[0].mxu1 }
 0x208   :  { %v292_v30 = vadd.f32 %v338_v28, %v291_v29  ;;  %v412_v31 = vpop.f32.mrb[1].mxu1 }
 0x209   :  { %v294_v32 = vpop.f32.mrb[2].mxu1 }
 0x20a   :  { %v295_v33 = vadd.f32 %v338_v28, %v294_v32  ;;  %v413_v34 = vpop.f32.mrb[3].mxu1  ;;  %v298_v35 = vmax.f32 %v292_v30, 0.0 }
 0x20c   :  { %v299_v36 = vmax.f32 %v295_v33, 0.0 }
 0x20e   :  { %v354_v37 = vpack.c.bf16 %v299_v36, %v298_v35 }
 0x210   :  { %355 = vst [vmem:[#allocation8] sm:$0xff] %v354_v37  }
 0x211   :  { %516 = shalt.err (!%p513_p0)
}
 0x212   :  { %s517_s12 = scalar_lea.hbm %s649_s5, 128 }
 0x213   :  { %p518_p1 = scmp.ne.s32.totalorder %s649_s5, %s517_s12  ;;  %p521_p2 = scmp.lt.u32.totalorder %s517_s12, %s649_s5 }
 0x215   :  { %p523_p3 = pnand %p521_p2, %p518_p1 }
 0x217   :  { %526 = shalt.err (!%p523_p3)
}
 0x218   :  { %321 = dma.vmem_to_hbm [thread:$0]  %s316_s9, 128, %s649_s5, [#allocation4], %s535_s30, %s535_s30, %s536_s6  }
 0x219   :  { %531 = dma.done.wait [#allocation4], 128  }
 0x21a   :  { %532 = vsyncadd [#allocation4], 4294967168 }
 0x21b   :  { %325 = vsyncpa [#allocation3], 1 }
 0x21c   :  { %326 = vsyncpa [#allocation6], 1 }
 0x21d   :  { %327 = vsyncpa [#allocation4], 1 }

</bundles_post_ra>
